<compile_context>
chip_gen: v7x
topology: tpu7x:2x2x1
jax: 0.10.0
libtpu: 0.0.40
codegen_flags: <defaults>
</compile_context>

<pallas_src>
import functools

import jax
import jax.numpy as jnp
from jax.experimental import pallas as pl
from jax.experimental.pallas import tpu as pltpu


_NEG_BIG = -1e30  # stand-in for -inf that keeps exp()/max() NaN-free


def _logit_adjusted_loss_kernel(logit_ref, w_ref, target_ref, out_ref,
                                m_sc, l_sc, tgt_sc, *,
                                n, c, tn, tc, num_ct, use_mxu):
    i = pl.program_id(0)          # batch tile            ("parallel")
    j = pl.program_id(1)          # class tile, reduction ("arbitrary", innermost)

    @pl.when(j == 0)
    def _init():
        m_sc[...] = jnp.full(m_sc.shape, _NEG_BIG, dtype=jnp.float32)
        l_sc[...] = jnp.zeros(l_sc.shape, dtype=jnp.float32)
        tgt_sc[...] = jnp.zeros(tgt_sc.shape, dtype=jnp.float32)

    # Raw logits, cast to f32 in-kernel (HBM side stays in the native dtype).
    raw = logit_ref[...].astype(jnp.float32)                       # (tn, tc)
    # Tile-local column ids (loop invariant: no per-tile global offset add).
    local = jax.lax.broadcasted_iota(jnp.int32, (tn, tc), 1)

    def update(x):
        """One online-logsumexp step on a (possibly masked) logit tile."""
        m_prev = m_sc[...]
        m_new = jnp.maximum(m_prev, jnp.max(x, axis=-1, keepdims=True))
        p = jnp.exp(x - m_new)                                      # (tn, tc), in [0, 1]
        if use_mxu:
            # Weighted lane-sum on the (idle) MXU: contract the class axis of
            # `p` with the class axis of the (1, tc) weight row (q @ k.T
            # pattern).  The weights already carry the exp'd log-prior, so
            # the prior never touches the VPU.
            tile_sum = jax.lax.dot_general(
                p, w_ref[...],
                dimension_numbers=(((1,), (1,)), ((), ())),
                preferred_element_type=jnp.float32)                 # (tn, 1)
        else:
            tile_sum = jnp.sum(p * w_ref[...], axis=-1, keepdims=True)
        l_sc[...] = l_sc[...] * jnp.exp(m_prev - m_new) + tile_sum
        m_sc[...] = m_new
        # Fused gather of the *raw* logit at the target class.  Exactly one
        # column matches per row, so the f32 select+sum is exact; kept on the
        # VPU to avoid a second MXU pass per tile.
        t_local = target_ref[...] - j * tc                          # (tn, 1)
        tgt_sc[...] += jnp.sum(jnp.where(local == t_local, x, 0.0),
                               axis=-1, keepdims=True)

    if c % tc != 0:
        # Only the last class tile can be partial: mask it there, let all
        # full tiles take the unmasked fast path (runtime executes one branch).
        rem = c - (num_ct - 1) * tc   # static remainder

        @pl.when(j != num_ct - 1)
        def _full():
            update(raw)

        @pl.when(j == num_ct - 1)
        def _partial():
            update(jnp.where(local < rem, raw, _NEG_BIG))
    else:
        update(raw)

    @pl.when(j == num_ct - 1)
    def _finalize():
        # lse(adj) - p_max - raw_logit[target]; the wrapper re-adds the prior.
        per_sample = m_sc[...] + jnp.log(l_sc[...]) - tgt_sc[...]
        if n % tn != 0:
            row = i * tn + jax.lax.broadcasted_iota(jnp.int32, (tn, 1), 0)
            per_sample = jnp.where(row < n, per_sample, 0.0)
        out_ref[...] = per_sample


def _round_up(x, m):
    return ((x + m - 1) // m) * m


def _tpu_params():
    """Best-effort, generation-aware VMEM budget and TensorCore count."""
    phys_vmem = 64 * 1024 * 1024      # conservative default (v7x per-core VMEM)
    num_cores = 1
    try:
        info = pltpu.get_tpu_info()
        v = int(getattr(info, "vmem_capacity_bytes", 0) or 0)
        if v > 0:
            phys_vmem = v
        for name in ("num_tensorcores", "tensorcore_count", "num_cores",
                     "core_count"):
            cc = getattr(info, name, None)
            if isinstance(cc, int) and cc > 0:
                num_cores = cc
                break
    except Exception:
        pass
    # Leave headroom for Mosaic internal scratch; never ask for more than 96 MiB.
    budget = max(32 * 1024 * 1024,
                 min(phys_vmem - 16 * 1024 * 1024, 96 * 1024 * 1024))
    return budget, num_cores


def _pick_tiles(n, c, itemsize, vmem_budget, num_cores):
    pack = max(8, 32 // itemsize)     # sublane packing: f32 -> 8, bf16 -> 16
    # Batch tile: full batch when small, but split so every TensorCore (v7x
    # megacore) gets at least one tile of the "parallel" axis.
    if n <= 512:
        tn = n
        if num_cores > 1 and n > pack:
            tn = pl.cdiv(n, num_cores)
        tn = _round_up(tn, pack)
    else:
        tn = 512
    # Class tile: largest lane-aligned tile whose double-buffered logit block
    # stays within ~half of the VMEM budget.
    if c <= 2048:
        tc = c
    else:
        tc = 2048
        for cand in (8192, 4096):
            if 2 * tn * cand * itemsize <= vmem_budget // 2:
                tc = cand
                break
        tc = min(tc, _round_up(c, 128))
    return tn, tc


def logit_adjusted_loss(logit, log_cls_num, target, tau=1.0,
                        block_n=None, block_c=None):
    """mean(cross_entropy(logit + tau * log_cls_num[None, :], target))."""
    n, c = logit.shape
    itemsize = jnp.dtype(logit.dtype).itemsize
    pack = max(8, 32 // itemsize)
    vmem_budget, num_cores = _tpu_params()
    auto_tn, auto_tc = _pick_tiles(n, c, itemsize, vmem_budget, num_cores)
    tn = auto_tn if block_n is None else _round_up(block_n, pack)
    tc = auto_tc if block_c is None else block_c

    n_bt = pl.cdiv(n, tn)
    n_ct = pl.cdiv(c, tc)
    c_pad = n_ct * tc

    # Prior folding:  lse(logit + prior) = p_max + log(sum_j exp(logit_j)*w_j)
    # with w_j = exp(prior_j - p_max).  The kernel works on raw logits and the
    # zero-padded weight row; p_max and prior[target] are re-applied here.
    prior = jnp.float32(tau) * log_cls_num.astype(jnp.float32)        # (c,)
    p_max = jnp.max(prior)
    w = jnp.exp(prior - p_max)                                        # (c,)
    w_row = jnp.zeros((1, c_pad), jnp.float32).at[0, :c].set(w)       # zero-padded

    target_2d = target.reshape(n, 1).astype(jnp.int32)

    # Tight but head-roomed VMEM request (review: never hand Mosaic the whole
    # physical VMEM on v7x).
    need = (2 * tn * tc * itemsize        # double-buffered logit blocks
            + 2 * 8 * tc * 4              # (1, tc) weight blocks (sublane-padded)
            + 7 * tn * 512)               # targets / out / scratch, (tn,1) tiles
    vmem_limit = int(min(vmem_budget, max(32 * 1024 * 1024,
                                          need + 8 * 1024 * 1024)))

    def build(use_mxu):
        kernel = functools.partial(
            _logit_adjusted_loss_kernel,
            n=n, c=c, tn=tn, tc=tc, num_ct=n_ct, use_mxu=use_mxu)
        return pl.pallas_call(
            kernel,
            out_shape=jax.ShapeDtypeStruct((n, 1), jnp.float32),
            grid_spec=pltpu.PrefetchScalarGridSpec(
                num_scalar_prefetch=0,
                grid=(n_bt, n_ct),
                in_specs=[
                    pl.BlockSpec((tn, tc), lambda i, j: (i, j)),   # logits (native dtype)
                    pl.BlockSpec((1, tc), lambda i, j: (0, j)),    # exp'd prior weights
                    pl.BlockSpec((tn, 1), lambda i, j: (i, 0)),    # targets
                ],
                out_specs=pl.BlockSpec((tn, 1), lambda i, j: (i, 0)),
                scratch_shapes=[
                    pltpu.VMEM((tn, 1), jnp.float32),   # running max (raw logits)
                    pltpu.VMEM((tn, 1), jnp.float32),   # running weighted sum(exp)
                    pltpu.VMEM((tn, 1), jnp.float32),   # gathered raw target logit
                ],
            ),
            compiler_params=pltpu.CompilerParams(
                dimension_semantics=("parallel", "arbitrary"),
                vmem_limit_bytes=vmem_limit,
            ),
        )

    # MXU lane-reduction only pays off on lane-aligned class tiles; if this
    # jax/Mosaic build rejects the narrow (tn,tc)x(1,tc)^T matmul, fall back
    # to the exact VPU sum (identical semantics).
    want_mxu = (tc % 128 == 0) and tc >= 128
    per_sample = None
    for use_mxu in ((True, False) if want_mxu else (False,)):
        try:
            per_sample = build(use_mxu)(logit, w_row, target_2d)
            break
        except Exception:
            if not use_mxu:
                raise

    loss = per_sample[:, 0] + p_max - jnp.take(prior, target)
    return jnp.mean(loss)


def _reference(logit, log_cls_num, target, tau=1.0):
    adj = logit.astype(jnp.float32) + tau * log_cls_num[None, :].astype(jnp.float32)
    lse = jax.scipy.special.logsumexp(adj, axis=-1)
    tgt = jnp.take_along_axis(adj, target[:, None], axis=-1)[:, 0]
    return jnp.mean(lse - tgt)


if __name__ == "__main__":
    key = jax.random.PRNGKey(0)
    k1, k2, k3, k4 = jax.random.split(key, 4)

    # --- Module-sized case: batch=8, num_classes=16, f32 logits ---
    N, C = 8, 16
    tau = 1.0
    cls_num_list = (jnp.arange(C, dtype=jnp.float32) + 1.0) * 10.0
    log_cls_num = jnp.log(cls_num_list / jnp.sum(cls_num_list))

    logit = jax.random.normal(k1, (N, C), dtype=jnp.float32)
    target = jax.random.randint(k2, (N,), 0, C, dtype=jnp.int32)

    loss = jax.block_until_ready(
        logit_adjusted_loss(logit, log_cls_num, target, tau=tau))
    ref = _reference(logit, log_cls_num, target, tau=tau)
    assert jnp.allclose(loss, ref, atol=2e-5, rtol=2e-5), (loss, ref)

    # --- Tiled path: bf16 logits, partial batch & class tiles, MXU reduction ---
    N2, C2 = 20, 200
    cls2 = jnp.arange(C2, dtype=jnp.float32) + 1.0
    log_cls2 = jnp.log(cls2 / jnp.sum(cls2))
    logit2 = jax.random.normal(k3, (N2, C2), dtype=jnp.float32).astype(jnp.bfloat16)
    target2 = jax.random.randint(k4, (N2,), 0, C2, dtype=jnp.int32)

    loss2 = jax.block_until_ready(
        logit_adjusted_loss(logit2, log_cls2, target2, tau=0.7,
                            block_n=8, block_c=128))
    ref2 = _reference(logit2.astype(jnp.float32), log_cls2, target2, tau=0.7)
    # The MXU reduction may run the f32 products at reduced (bf16-ish)
    # precision depending on the Mosaic matmul mode; allow bf16-level slack.
    assert jnp.allclose(loss2, ref2, atol=2e-2, rtol=2e-2), (loss2, ref2)

    print("KERNEL_OK")
</pallas_src>

<mosaic_0001>
module attributes {stable_mosaic.version = 11 : i64} {
  func.func @_logit_adjusted_loss_kernel(%arg0: i32, %arg1: i32, %arg2: memref<8x16xf32, #tpu.memory_space<vmem>>, %arg3: memref<1x16xf32, #tpu.memory_space<vmem>>, %arg4: memref<8x1xi32, #tpu.memory_space<vmem>>, %arg5: memref<8x1xf32, #tpu.memory_space<vmem>>, %arg6: memref<8x1xf32, #tpu.memory_space<vmem>>, %arg7: memref<8x1xf32, #tpu.memory_space<vmem>>, %arg8: memref<8x1xf32, #tpu.memory_space<vmem>>) attributes {dimension_semantics = [#tpu.dimension_semantics<parallel>, #tpu.dimension_semantics<arbitrary>], iteration_bounds = array<i64: 1, 1>, scalar_prefetch = 0 : i64, scratch_operands = 3 : i64, tpu.core_type = #tpu.core_type<tc>, window_params = [{transform_indices = @transform_0, window_bounds = array<i64: 8, 16>}, {transform_indices = @transform_1, window_bounds = array<i64: 1, 16>}, {transform_indices = @transform_2, window_bounds = array<i64: 8, 1>}, {transform_indices = @transform_3, window_bounds = array<i64: 8, 1>}]} {
    %c0_i32 = arith.constant 0 : i32
    %0 = arith.cmpi eq, %arg1, %c0_i32 : i32
    %1 = arith.extui %0 : i1 to i32
    %c0_i32_0 = arith.constant 0 : i32
    %2 = arith.cmpi ne, %1, %c0_i32_0 : i32
    scf.if %2 {
      %cst_23 = arith.constant -1.000000e+30 : f32
      %40 = vector.broadcast %cst_23 : f32 to vector<8x1xf32>
      %c0_24 = arith.constant 0 : index
      %c0_25 = arith.constant 0 : index
      %41 = vector.load %arg6[%c0_24, %c0_25] : memref<8x1xf32, #tpu.memory_space<vmem>>, vector<8x1xf32>
      tpu.vector_store %arg6[%c0_24, %c0_25], %40 {strides = array<i32>} : memref<8x1xf32, #tpu.memory_space<vmem>>, vector<8x1xf32>,
      %cst_26 = arith.constant 0.000000e+00 : f32
      %42 = vector.broadcast %cst_26 : f32 to vector<8x1xf32>
      %c0_27 = arith.constant 0 : index
      %c0_28 = arith.constant 0 : index
      %43 = vector.load %arg7[%c0_27, %c0_28] : memref<8x1xf32, #tpu.memory_space<vmem>>, vector<8x1xf32>
      tpu.vector_store %arg7[%c0_27, %c0_28], %42 {strides = array<i32>} : memref<8x1xf32, #tpu.memory_space<vmem>>, vector<8x1xf32>,
      %cst_29 = arith.constant 0.000000e+00 : f32
      %44 = vector.broadcast %cst_29 : f32 to vector<8x1xf32>
      %c0_30 = arith.constant 0 : index
      %c0_31 = arith.constant 0 : index
      %45 = vector.load %arg8[%c0_30, %c0_31] : memref<8x1xf32, #tpu.memory_space<vmem>>, vector<8x1xf32>
      tpu.vector_store %arg8[%c0_30, %c0_31], %44 {strides = array<i32>} : memref<8x1xf32, #tpu.memory_space<vmem>>, vector<8x1xf32>,
    } else {
    }
    %c0 = arith.constant 0 : index
    %c0_1 = arith.constant 0 : index
    %3 = vector.load %arg2[%c0, %c0_1] : memref<8x16xf32, #tpu.memory_space<vmem>>, vector<8x16xf32>
    %4 = tpu.iota {dimensions = array<i32: 1>} : vector<8x16xi32>
    %c0_2 = arith.constant 0 : index
    %c0_3 = arith.constant 0 : index
    %5 = vector.load %arg6[%c0_2, %c0_3] : memref<8x1xf32, #tpu.memory_space<vmem>>, vector<8x1xf32>
    %cst = arith.constant dense<0xFF800000> : vector<8xf32>
    %6 = vector.multi_reduction <maximumf>, %3, %cst [1] : vector<8x16xf32> to vector<8xf32>
    %7 = vector.shape_cast %6 : vector<8xf32> to vector<8x1xf32>
    %8 = arith.maximumf %5, %7 : vector<8x1xf32>
    %9 = vector.broadcast %8 : vector<8x1xf32> to vector<8x16xf32>
    %10 = arith.subf %3, %9 : vector<8x16xf32>
    %11 = math.exp %10 : vector<8x16xf32>
    %c0_4 = arith.constant 0 : index
    %c0_5 = arith.constant 0 : index
    %12 = vector.load %arg3[%c0_4, %c0_5] : memref<1x16xf32, #tpu.memory_space<vmem>>, vector<1x16xf32>
    %13 = vector.broadcast %12 : vector<1x16xf32> to vector<8x16xf32>
    %14 = arith.mulf %11, %13 : vector<8x16xf32>
    %cst_6 = arith.constant dense<0.000000e+00> : vector<8xf32>
    %15 = vector.multi_reduction <add>, %14, %cst_6 [1] : vector<8x16xf32> to vector<8xf32>
    %16 = vector.shape_cast %15 : vector<8xf32> to vector<8x1xf32>
    %c0_7 = arith.constant 0 : index
    %c0_8 = arith.constant 0 : index
    %17 = vector.load %arg7[%c0_7, %c0_8] : memref<8x1xf32, #tpu.memory_space<vmem>>, vector<8x1xf32>
    %18 = arith.subf %5, %8 : vector<8x1xf32>
    %19 = math.exp %18 : vector<8x1xf32>
    %20 = arith.mulf %17, %19 : vector<8x1xf32>
    %21 = arith.addf %20, %16 : vector<8x1xf32>
    %c0_9 = arith.constant 0 : index
    %c0_10 = arith.constant 0 : index
    %22 = vector.load %arg7[%c0_9, %c0_10] : memref<8x1xf32, #tpu.memory_space<vmem>>, vector<8x1xf32>
    tpu.vector_store %arg7[%c0_9, %c0_10], %21 {strides = array<i32>} : memref<8x1xf32, #tpu.memory_space<vmem>>, vector<8x1xf32>,
    %c0_11 = arith.constant 0 : index
    %c0_12 = arith.constant 0 : index
    %23 = vector.load %arg6[%c0_11, %c0_12] : memref<8x1xf32, #tpu.memory_space<vmem>>, vector<8x1xf32>
    tpu.vector_store %arg6[%c0_11, %c0_12], %8 {strides = array<i32>} : memref<8x1xf32, #tpu.memory_space<vmem>>, vector<8x1xf32>,
    %c0_13 = arith.constant 0 : index
    %c0_14 = arith.constant 0 : index
    %24 = vector.load %arg4[%c0_13, %c0_14] : memref<8x1xi32, #tpu.memory_space<vmem>>, vector<8x1xi32>
    %c16_i32 = arith.constant 16 : i32
    %25 = arith.muli %arg1, %c16_i32 : i32
    %26 = vector.broadcast %25 : i32 to vector<8x1xi32>
    %27 = arith.subi %24, %26 : vector<8x1xi32>
    %c0_15 = arith.constant 0 : index
    %c0_16 = arith.constant 0 : index
    %28 = vector.load %arg8[%c0_15, %c0_16] : memref<8x1xf32, #tpu.memory_space<vmem>>, vector<8x1xf32>
    %29 = vector.broadcast %27 : vector<8x1xi32> to vector<8x16xi32>
    %30 = arith.cmpi eq, %4, %29 : vector<8x16xi32>
    %cst_17 = arith.constant 0.000000e+00 : f32
    %31 = vector.broadcast %cst_17 : f32 to vector<8x16xf32>
    %32 = arith.select %30, %3, %31 : vector<8x16xi1>, vector<8x16xf32>
    %cst_18 = arith.constant dense<0.000000e+00> : vector<8xf32>
    %33 = vector.multi_reduction <add>, %32, %cst_18 [1] : vector<8x16xf32> to vector<8xf32>
    %34 = vector.shape_cast %33 : vector<8xf32> to vector<8x1xf32>
    %35 = arith.addf %28, %34 : vector<8x1xf32>
    %c0_19 = arith.constant 0 : index
    %c0_20 = arith.constant 0 : index
    %36 = vector.load %arg8[%c0_19, %c0_20] : memref<8x1xf32, #tpu.memory_space<vmem>>, vector<8x1xf32>
    tpu.vector_store %arg8[%c0_19, %c0_20], %35 {strides = array<i32>} : memref<8x1xf32, #tpu.memory_space<vmem>>, vector<8x1xf32>,
    %c0_i32_21 = arith.constant 0 : i32
    %37 = arith.cmpi eq, %arg1, %c0_i32_21 : i32
    %38 = arith.extui %37 : i1 to i32
    %c0_i32_22 = arith.constant 0 : i32
    %39 = arith.cmpi ne, %38, %c0_i32_22 : i32
    scf.if %39 {
      %c0_23 = arith.constant 0 : index
      %c0_24 = arith.constant 0 : index
      %40 = vector.load %arg6[%c0_23, %c0_24] : memref<8x1xf32, #tpu.memory_space<vmem>>, vector<8x1xf32>
      %c0_25 = arith.constant 0 : index
      %c0_26 = arith.constant 0 : index
      %41 = vector.load %arg7[%c0_25, %c0_26] : memref<8x1xf32, #tpu.memory_space<vmem>>, vector<8x1xf32>
      %42 = math.log %41 : vector<8x1xf32>
      %43 = arith.addf %40, %42 : vector<8x1xf32>
      %c0_27 = arith.constant 0 : index
      %c0_28 = arith.constant 0 : index
      %44 = vector.load %arg8[%c0_27, %c0_28] : memref<8x1xf32, #tpu.memory_space<vmem>>, vector<8x1xf32>
      %45 = arith.subf %43, %44 : vector<8x1xf32>
      %c0_29 = arith.constant 0 : index
      %c0_30 = arith.constant 0 : index
      %46 = vector.load %arg5[%c0_29, %c0_30] : memref<8x1xf32, #tpu.memory_space<vmem>>, vector<8x1xf32>
      tpu.vector_store %arg5[%c0_29, %c0_30], %45 {strides = array<i32>} : memref<8x1xf32, #tpu.memory_space<vmem>>, vector<8x1xf32>,
    } else {
    }
    return
  }
  func.func @transform_0(%arg0: i32, %arg1: i32) -> (i32, i32) {
    %c0_i32 = arith.constant 0 : i32
    return %arg0, %arg1 : i32, i32
  }
  func.func @transform_1(%arg0: i32, %arg1: i32) -> (i32, i32) {
    %c0_i32 = arith.constant 0 : i32
    %c0_i32_0 = arith.constant 0 : i32
    return %c0_i32, %arg1 : i32, i32
  }
  func.func @transform_2(%arg0: i32, %arg1: i32) -> (i32, i32) {
    %c0_i32 = arith.constant 0 : i32
    %c0_i32_0 = arith.constant 0 : i32
    return %arg0, %c0_i32 : i32, i32
  }
  func.func @transform_3(%arg0: i32, %arg1: i32) -> (i32, i32) {
    %c0_i32 = arith.constant 0 : i32
    %c0_i32_0 = arith.constant 0 : i32
    return %arg0, %c0_i32 : i32, i32
  }
}

</mosaic_0001>

<bundles_post_ra>
// kernel: tpu_custom_call.1
= control target key start
LH: loop header
LB: loop body
LE: loop exit
PB: predicated region body
PF: predicated region fallthrough
CT: control target
= control target key end

     0   :  { %vm26_vm0 = vcmask 130048   ;;  %vm18_vm1 = vcmask 7168   ;;  %v101_v1 = vmov -1e+30   ;;  %v102_v3 = vmov 0   ;;  %s146_s0 = inlined_call_operand.vmem [shape: f32[8,16], index: 0, kind: input, shape index: {}]   ;;  %s147_s2 = inlined_call_operand.vmem [shape: s32[8,1], index: 2, kind: input, shape index: {}]   ;;  %s148_s1 = inlined_call_operand.vmem [shape: f32[1,16], index: 1, kind: input, shape index: {}]   ;;  %s149_s3 = inlined_call_operand.vmem [shape: f32[8,1], index: 3, kind: output, shape index: {}]  }
   0x1   :  { %v22_v0 = vld [vmem:[%s146_s0] sm:$0xff]  ;;  %19 = vst.msk [vmem:[#allocation2] sm:$0xff] %vm18_vm1, %v101_v1  ;;  %93 = vset.pattern.permute.xlu0 %v102_v3  ;;  %94 = vset.pattern.permute.xlu1 %v102_v3  ;;  %v103_v4 = vmov 0.0   ;;  %v23_v13 = vlaneseq }
   0x2   :  { %v27_v2 = vsel %vm26_vm0, %v22_v0, -inf  ;;  %20 = vst.msk [vmem:[#allocation3] sm:$0xff] %vm18_vm1, %v103_v4  ;;  %21 = vst.msk [vmem:[#allocation4] sm:$0xff] %vm18_vm1, %v103_v4  ;;  %v59_v5 = vld [vmem:[%s147_s2] sm:$0xff] }
   0x3   :  { %28 = vmax.xlane.f32.xlu0 %v27_v2  ;;  %65 = vperm.xlu1 %94, %v59_v5   ;;  %v24_v14 = vand.u32 127, %v23_v13  ;;  %v89_v16 = vld [vmem:[%s148_s1] ss:$0 sm:$0xff] }
   0x8   :  { %v25_v6 = vld [vmem:[#allocation2] sm:$0xff] }
   0x9   :  { %v50_v24 = vld [vmem:[#allocation3] sm:$0xff]  ;;  %v63_v28 = vld [vmem:[#allocation4] sm:$0xff] }
  0x82   :  { %v66_v15 = vpop.permute.xlu1 %65 }
  0x83   :  { %vm67_vm2 = vcmp.eq.s32.totalorder %v24_v14, %v66_v15 }
  0x84   :  { %v68_v19 = vsel %vm67_vm2, %v22_v0, 0.0 }
  0x85   :  { %v69_v21 = vsel %vm26_vm0, %v68_v19, 0.0 }
  0x90   :  { %v29_v7 = vpop.xlane.xlu0 %28 }
  0x91   :  { %v30_v8 = vmax.f32 %v25_v6, %v29_v7 }
  0x93   :  { %v51_v9 = vsub.f32 %v25_v6, %v30_v8  ;;  %58 = vst.msk [vmem:[#allocation2] sm:$0xff] %vm18_vm1, %v30_v8  ;;  %33 = vperm.xlu0 %93, %v30_v8  }
  0x95   :  { %v52_v22 = vmul.f32 1.442695, %v51_v9 }
  0x9a   :  { %v77_v34 = vld [vmem:[#allocation2] sm:$0xff] }
 0x112   :  { %v34_v10 = vpop.permute.xlu0 %33 }
 0x113   :  { %v36_v11 = vsub.f32 %v22_v0, %v34_v10 }
 0x115   :  { %v37_v12 = vmul.f32 1.442695, %v36_v11 }
 0x117   :  { %95 = vpow2.f32 %v37_v12 }
 0x118   :  { %97 = vpow2.f32 %v52_v22 }
 0x121   :  { %v96_v17 = vpop.eup %95 }
 0x122   :  { %v46_v18 = vmul.f32 %v96_v17, %v89_v16  ;;  %v98_v23 = vpop.eup %97 }
 0x123   :  { %v54_v25 = vmul.f32 %v98_v23, %v50_v24 }
 0x124   :  { %v47_v20 = vsel %vm26_vm0, %v46_v18, 0.0 }
 0x125   :  { %48 = vadd.xlane.f32.xlu1 %v47_v20 }
 0x129   :  { %70 = vadd.xlane.f32.xlu1 %v69_v21 }
 0x1b2   :  { %v49_v26 = vpop.xlane.xlu1 %48 }
 0x1b3   :  { %v55_v27 = vadd.f32 %v54_v25, %v49_v26 }
 0x1b5   :  { %57 = vst.msk [vmem:[#allocation3] sm:$0xff] %vm18_vm1, %v55_v27 }
 0x1b6   :  { %v71_v29 = vpop.xlane.xlu1 %70 }
 0x1b7   :  { %v72_v30 = vadd.f32 %v71_v29, %v63_v28 }
 0x1b9   :  { %73 = vst.msk [vmem:[#allocation4] sm:$0xff] %vm18_vm1, %v72_v30 }
 0x1bc   :  { %v78_v31 = vld [vmem:[#allocation3] sm:$0xff] }
 0x1bd   :  { %99 = vlog2.f32 %v78_v31 }
 0x1c0   :  { %v82_v35 = vld [vmem:[#allocation4] sm:$0xff] }
 0x1c7   :  { %v100_v32 = vpop.eup %99 }
 0x1c8   :  { %v80_v33 = vmul.f32 0.6931472, %v100_v32 }
 0x1ca   :  { %v81_v36 = vadd.f32 %v80_v33, %v77_v34 }
 0x1cc   :  { %v83_v37 = vsub.f32 %v81_v36, %v82_v35 }
 0x1ce   :  { %84 = vst.msk [vmem:[%s149_s3] sm:$0xff] %vm18_vm1, %v83_v37 }

</bundles_post_ra>
